<compile_context>
chip_gen: v7x
topology: tpu7x:2x2x1
jax: 0.10.0
libtpu: 0.0.40
codegen_flags: <defaults>
</compile_context>

<pallas_src>
import functools

import jax
import jax.numpy as jnp
from jax.experimental import pallas as pl
from jax.experimental.pallas import tpu as pltpu


def _round_up(x, m):
    return (x + m - 1) // m * m


def _conv_bn_add_relu6_kernel(x_ref, w_ref, b_ref, r_ref, o_ref, *, kh_count, dh):
    # x_ref: (1, Hp_pad, Wo_pad, K)   KW-folded padded input plane (K = KW*Cin)
    #                                  resident across the co / h grid axes.
    # w_ref: (KH, K, tco)              BN-folded, KW-folded weights (Cout tile)
    # b_ref: (1, tco)                  BN-folded bias (f32)
    # r_ref: (1, th, Wo_pad, tco)      residual tile (f32)
    # o_ref: (1, th, Wo_pad, tco)      output tile
    h = pl.program_id(2)
    _, th, wo, tco = o_ref.shape
    k = x_ref.shape[3]
    rows = th * wo
    h0 = h * th  # first output row of this tile (padded-output coordinates)

    acc = jnp.zeros((rows, tco), jnp.float32)
    # Static unroll over the KH taps.  The H slice is on a leading
    # (non-layout) dim and Wo_pad % 8 == 0, so slice + reshape are
    # relayout-free; each tap is one (rows, K) @ (K, tco) MXU matmul.
    for kh in range(kh_count):
        patch = x_ref[:, pl.ds(h0 + kh * dh, th), :, :].reshape(rows, k)
        acc = acc + jnp.dot(patch, w_ref[kh], preferred_element_type=jnp.float32)

    # Epilogue (VPU, f32): folded-BN bias, residual add, ReLU6 clip.
    acc = acc + b_ref[...].astype(jnp.float32)
    acc = acc.reshape(1, th, wo, tco) + r_ref[...].astype(jnp.float32)
    o_ref[...] = jnp.clip(acc, 0.0, 6.0).astype(o_ref.dtype)


@functools.partial(jax.jit, static_argnames=("stride", "padding", "dilation",
                                              "eps", "compute_dtype"))
def conv_bn_add_relu6(x1, x2, conv_w, conv_b, gamma, beta, mean, var, *,
                      stride=(1, 1), padding=(1, 1), dilation=(1, 1),
                      eps=1e-5, compute_dtype=jnp.float32):
    """Fused Conv2d + BatchNorm2d (folded, eval mode) + add + ReLU6.

    x1:     (N, Cin, H, W)       torch NCHW layout
    x2:     (N, Cout, Ho, Wo)    residual, added before the clip
    conv_w: (Cout, Cin, KH, KW)  torch Conv2d weight layout
    conv_b: (Cout,) or None
    gamma, beta, mean, var: (Cout,) BatchNorm parameters / running stats
    compute_dtype: matmul operand dtype (bf16 recommended on v6e/v7x);
                   accumulation is always f32.
    returns (N, Cout, Ho, Wo)
    """
    assert stride == (1, 1), "only stride=1 supported"
    N, Cin, H, W = x1.shape
    Cout, Cin2, KH, KW = conv_w.shape
    assert Cin == Cin2, "groups != 1 not supported"
    dh, dw = dilation
    ph, pw = padding

    Ho = H + 2 * ph - dh * (KH - 1)
    Wo = W + 2 * pw - dw * (KW - 1)
    assert x2.shape == (N, Cout, Ho, Wo), "residual shape must match conv output"

    # ---- Fold BatchNorm (eval-mode running stats) into weight / bias -------
    scale = gamma * jax.lax.rsqrt(var + eps)
    w_f = conv_w * scale[:, None, None, None]
    if conv_b is not None:
        b_f = (conv_b - mean) * scale + beta
    else:
        b_f = beta - mean * scale

    # ---- Tiling decisions ---------------------------------------------------
    Cout_p = _round_up(Cout, 128)            # lane-dense output stores
    tco = 256 if (Cout_p % 256 == 0) else 128
    Wo_pad = _round_up(Wo, 8)                # sublane-aligned (th*Wo, K) reshape
    K = KW * Cin
    comp_bytes = jnp.dtype(compute_dtype).itemsize

    # H tile: target ~1024 matmul rows per step; shrink until the VMEM
    # residency fits a conservative budget (v7x only has 64 MiB physical).
    budget = 40 << 20
    th = max(1, min(Ho, 1024 // max(Wo_pad, 1)))
    while True:
        Ho_pad = _round_up(Ho, th)
        Hp_pad = Ho_pad + dh * (KH - 1)
        in_b = Hp_pad * Wo_pad * K * comp_bytes          # folded input plane
        w_b = KH * K * tco * comp_bytes                  # weight tile
        tile_b = th * Wo_pad * tco * 4                   # f32 resid/out/acc tile
        needed = 2 * in_b + 2 * w_b + 2 * 8 * tco * 4 + 5 * tile_b
        if needed <= budget or th == 1:
            break
        th = max(1, th // 2)
    n_h = Ho_pad // th
    n_co = Cout_p // tco

    # ---- Wrapper-side layout prep (NCHW -> NHWC, pad, KW-fold) -------------
    # TODO(synk): the module boundary is torch-NCHW; keeping activations NHWC
    # across fused ops would remove these transposes entirely.
    x_nhwc = jnp.transpose(x1, (0, 2, 3, 1))
    x_pad = jnp.pad(
        x_nhwc,
        ((0, 0), (ph, ph + (Ho_pad - Ho)), (pw, pw + (Wo_pad - Wo)), (0, 0)))
    # Fold the KW taps into the contraction dim:
    #   x_fold[n, h, w, kw*Cin + c] = x_pad[n, h, w + kw*dw, c]
    x_fold = jnp.concatenate(
        [x_pad[:, :, kw * dw: kw * dw + Wo_pad, :] for kw in range(KW)],
        axis=-1).astype(compute_dtype)

    # (Cout, Cin, KH, KW) -> (KH, KW*Cin, Cout_p), K order matching x_fold.
    w_mat = jnp.transpose(w_f, (2, 3, 1, 0)).reshape(KH, K, Cout)
    w_mat = jnp.pad(w_mat, ((0, 0), (0, 0), (0, Cout_p - Cout))).astype(compute_dtype)
    b_row = jnp.pad(b_f, (0, Cout_p - Cout)).reshape(1, Cout_p).astype(jnp.float32)

    r_nhwc = jnp.transpose(x2, (0, 2, 3, 1)).astype(jnp.float32)
    r_pad = jnp.pad(
        r_nhwc,
        ((0, 0), (0, Ho_pad - Ho), (0, Wo_pad - Wo), (0, Cout_p - Cout)))

    kernel = functools.partial(_conv_bn_add_relu6_kernel, kh_count=KH, dh=dh)

    out_nhwc = pl.pallas_call(
        kernel,
        out_shape=jax.ShapeDtypeStruct((N, Ho_pad, Wo_pad, Cout_p), x1.dtype),
        grid_spec=pltpu.PrefetchScalarGridSpec(
            num_scalar_prefetch=0,
            # h innermost: weight tile fetched once per (n, co); input plane
            # fetched once per n.
            grid=(N, n_co, n_h),
            in_specs=[
                pl.BlockSpec((1, Hp_pad, Wo_pad, K),
                             lambda n, co, h: (n, 0, 0, 0)),
                pl.BlockSpec((KH, K, tco),
                             lambda n, co, h: (0, 0, co)),
                pl.BlockSpec((1, tco),
                             lambda n, co, h: (0, co)),
                pl.BlockSpec((1, th, Wo_pad, tco),
                             lambda n, co, h: (n, h, 0, co)),
            ],
            out_specs=pl.BlockSpec((1, th, Wo_pad, tco),
                                   lambda n, co, h: (n, h, 0, co)),
        ),
        compiler_params=pltpu.CompilerParams(
            dimension_semantics=("parallel", "parallel", "parallel"),
            vmem_limit_bytes=int(min(max(needed + (8 << 20), 32 << 20),
                                     64 << 20)),
        ),
    )(x_fold, w_mat, b_row, r_pad)

    out = out_nhwc[:, :Ho, :Wo, :Cout]
    return jnp.transpose(out, (0, 3, 1, 2))


def _reference(x1, x2, conv_w, conv_b, gamma, beta, mean, var, *,
               padding, dilation, eps):
    y = jax.lax.conv_general_dilated(
        x1, conv_w, window_strides=(1, 1),
        padding=((padding[0], padding[0]), (padding[1], padding[1])),
        rhs_dilation=dilation, dimension_numbers=("NCHW", "OIHW", "NCHW"))
    if conv_b is not None:
        y = y + conv_b[None, :, None, None]
    s = gamma / jnp.sqrt(var + eps)
    y = (y - mean[None, :, None, None]) * s[None, :, None, None] \
        + beta[None, :, None, None]
    return jnp.clip(y + x2, 0.0, 6.0)


if __name__ == "__main__":
    key = jax.random.PRNGKey(0)
    k1, k2, kw_, kb, kg, kbe, km, kv = jax.random.split(key, 8)

    # Config 1: batch=2, Cin=4, 16x16, Cout=8, 3x3 conv, padding=1, with bias.
    N, Cin, H, W = 2, 4, 16, 16
    Cout, KH, KW = 8, 3, 3
    eps = 1e-5

    x1 = jax.random.normal(k1, (N, Cin, H, W), dtype=jnp.float32)
    x2 = jax.random.normal(k2, (N, Cout, H, W), dtype=jnp.float32)
    conv_w = jax.random.normal(kw_, (Cout, Cin, KH, KW), dtype=jnp.float32) * 0.2
    conv_b = jax.random.normal(kb, (Cout,), dtype=jnp.float32) * 0.1
    gamma = jax.random.uniform(kg, (Cout,), minval=0.5, maxval=1.5, dtype=jnp.float32)
    beta = jax.random.normal(kbe, (Cout,), dtype=jnp.float32) * 0.1
    mean = jax.random.normal(km, (Cout,), dtype=jnp.float32) * 0.1
    var = jax.random.uniform(kv, (Cout,), minval=0.5, maxval=1.5, dtype=jnp.float32)

    ref = _reference(x1, x2, conv_w, conv_b, gamma, beta, mean, var,
                     padding=(1, 1), dilation=(1, 1), eps=eps)

    # f32 operands: tight tolerance.
    out = conv_bn_add_relu6(x1, x2, conv_w, conv_b, gamma, beta, mean, var,
                            stride=(1, 1), padding=(1, 1), dilation=(1, 1),
                            eps=eps, compute_dtype=jnp.float32)
    out = jax.block_until_ready(out)
    assert out.shape == ref.shape
    err = float(jnp.max(jnp.abs(out - ref)))
    assert jnp.allclose(out, ref, atol=1e-4, rtol=1e-4), err

    # bf16 operands (v6e/v7x MXU path), f32 accumulation: relaxed tolerance.
    out_bf16 = conv_bn_add_relu6(x1, x2, conv_w, conv_b, gamma, beta, mean, var,
                                 stride=(1, 1), padding=(1, 1), dilation=(1, 1),
                                 eps=eps, compute_dtype=jnp.bfloat16)
    out_bf16 = jax.block_until_ready(out_bf16)
    err_bf16 = float(jnp.max(jnp.abs(out_bf16 - ref)))
    assert err_bf16 < 0.1, err_bf16

    # Config 2: odd sizes (Wo not a multiple of 8, Cout not a multiple of 128),
    # no conv bias -> exercises the padding / slicing paths.
    kk = jax.random.split(jax.random.PRNGKey(1), 7)
    N2, Cin2, H2, W2, Cout2 = 1, 3, 9, 13, 5
    x1b = jax.random.normal(kk[0], (N2, Cin2, H2, W2), dtype=jnp.float32)
    x2b = jax.random.normal(kk[1], (N2, Cout2, H2, W2), dtype=jnp.float32)
    wb = jax.random.normal(kk[2], (Cout2, Cin2, 3, 3), dtype=jnp.float32) * 0.2
    gb = jax.random.uniform(kk[3], (Cout2,), minval=0.5, maxval=1.5, dtype=jnp.float32)
    bb = jax.random.normal(kk[4], (Cout2,), dtype=jnp.float32) * 0.1
    mb = jax.random.normal(kk[5], (Cout2,), dtype=jnp.float32) * 0.1
    vb = jax.random.uniform(kk[6], (Cout2,), minval=0.5, maxval=1.5, dtype=jnp.float32)

    ref_b = _reference(x1b, x2b, wb, None, gb, bb, mb, vb,
                       padding=(1, 1), dilation=(1, 1), eps=eps)
    out_b = conv_bn_add_relu6(x1b, x2b, wb, None, gb, bb, mb, vb,
                              stride=(1, 1), padding=(1, 1), dilation=(1, 1),
                              eps=eps, compute_dtype=jnp.float32)
    out_b = jax.block_until_ready(out_b)
    err_b = float(jnp.max(jnp.abs(out_b - ref_b)))
    assert jnp.allclose(out_b, ref_b, atol=1e-4, rtol=1e-4), err_b

    print("KERNEL_OK")
</pallas_src>

<mosaic_0001>
module attributes {stable_mosaic.version = 11 : i64} {
  func.func @_conv_bn_add_relu6_kernel(%arg0: i32, %arg1: i32, %arg2: i32, %arg3: memref<1x18x16x12xf32, #tpu.memory_space<vmem>>, %arg4: memref<3x12x128xf32, #tpu.memory_space<vmem>>, %arg5: memref<1x128xf32, #tpu.memory_space<vmem>>, %arg6: memref<1x16x16x128xf32, #tpu.memory_space<vmem>>, %arg7: memref<1x16x16x128xf32, #tpu.memory_space<vmem>>) attributes {dimension_semantics = [#tpu.dimension_semantics<parallel>, #tpu.dimension_semantics<parallel>, #tpu.dimension_semantics<parallel>], iteration_bounds = array<i64: 2, 1, 1>, scalar_prefetch = 0 : i64, scratch_operands = 0 : i64, tpu.core_type = #tpu.core_type<tc>, window_params = [{transform_indices = @transform_0, window_bounds = array<i64: 1, 18, 16, 12>}, {transform_indices = @transform_1, window_bounds = array<i64: 3, 12, 128>}, {transform_indices = @transform_2, window_bounds = array<i64: 1, 128>}, {transform_indices = @transform_3, window_bounds = array<i64: 1, 16, 16, 128>}, {transform_indices = @transform_4, window_bounds = array<i64: 1, 16, 16, 128>}]} {
    %c16_i32 = arith.constant 16 : i32
    %0 = arith.muli %arg2, %c16_i32 : i32
    %cst = arith.constant 0.000000e+00 : f32
    %1 = vector.broadcast %cst : f32 to vector<256x128xf32>
    %c0_i32 = arith.constant 0 : i32
    %2 = arith.addi %0, %c0_i32 : i32
    %c0 = arith.constant 0 : index
    %3 = arith.index_cast %2 : i32 to index
    %c0_0 = arith.constant 0 : index
    %c0_1 = arith.constant 0 : index
    %4 = vector.load %arg3[%c0, %3, %c0_0, %c0_1] : memref<1x18x16x12xf32, #tpu.memory_space<vmem>>, vector<1x16x16x12xf32>
    %5 = vector.shape_cast %4 : vector<1x16x16x12xf32> to vector<256x12xf32>
    %c0_2 = arith.constant 0 : index
    %c0_3 = arith.constant 0 : index
    %c0_4 = arith.constant 0 : index
    %6 = vector.load %arg4[%c0_2, %c0_3, %c0_4] : memref<3x12x128xf32, #tpu.memory_space<vmem>>, vector<1x12x128xf32>
    %7 = vector.shape_cast %6 : vector<1x12x128xf32> to vector<12x128xf32>
    %cst_5 = arith.constant dense<0.000000e+00> : vector<256x128xf32>
    %8 = tpu.matmul %5, %7, %cst_5 {dimension_numbers = #tpu.dot_dimension_numbers<[1], [0], [0], [1], [0, 0, 1, 1], [], []>} : vector<256x12xf32>, vector<12x128xf32>, vector<256x128xf32> -> vector<256x128xf32>
    %9 = arith.addf %1, %8 : vector<256x128xf32>
    %c1_i32 = arith.constant 1 : i32
    %10 = arith.addi %0, %c1_i32 : i32
    %c0_6 = arith.constant 0 : index
    %11 = arith.index_cast %10 : i32 to index
    %c0_7 = arith.constant 0 : index
    %c0_8 = arith.constant 0 : index
    %12 = vector.load %arg3[%c0_6, %11, %c0_7, %c0_8] : memref<1x18x16x12xf32, #tpu.memory_space<vmem>>, vector<1x16x16x12xf32>
    %13 = vector.shape_cast %12 : vector<1x16x16x12xf32> to vector<256x12xf32>
    %c1 = arith.constant 1 : index
    %c0_9 = arith.constant 0 : index
    %c0_10 = arith.constant 0 : index
    %14 = vector.load %arg4[%c1, %c0_9, %c0_10] : memref<3x12x128xf32, #tpu.memory_space<vmem>>, vector<1x12x128xf32>
    %15 = vector.shape_cast %14 : vector<1x12x128xf32> to vector<12x128xf32>
    %cst_11 = arith.constant dense<0.000000e+00> : vector<256x128xf32>
    %16 = tpu.matmul %13, %15, %cst_11 {dimension_numbers = #tpu.dot_dimension_numbers<[1], [0], [0], [1], [0, 0, 1, 1], [], []>} : vector<256x12xf32>, vector<12x128xf32>, vector<256x128xf32> -> vector<256x128xf32>
    %17 = arith.addf %9, %16 : vector<256x128xf32>
    %c2_i32 = arith.constant 2 : i32
    %18 = arith.addi %0, %c2_i32 : i32
    %c0_12 = arith.constant 0 : index
    %19 = arith.index_cast %18 : i32 to index
    %c0_13 = arith.constant 0 : index
    %c0_14 = arith.constant 0 : index
    %20 = vector.load %arg3[%c0_12, %19, %c0_13, %c0_14] : memref<1x18x16x12xf32, #tpu.memory_space<vmem>>, vector<1x16x16x12xf32>
    %21 = vector.shape_cast %20 : vector<1x16x16x12xf32> to vector<256x12xf32>
    %c2 = arith.constant 2 : index
    %c0_15 = arith.constant 0 : index
    %c0_16 = arith.constant 0 : index
    %22 = vector.load %arg4[%c2, %c0_15, %c0_16] : memref<3x12x128xf32, #tpu.memory_space<vmem>>, vector<1x12x128xf32>
    %23 = vector.shape_cast %22 : vector<1x12x128xf32> to vector<12x128xf32>
    %cst_17 = arith.constant dense<0.000000e+00> : vector<256x128xf32>
    %24 = tpu.matmul %21, %23, %cst_17 {dimension_numbers = #tpu.dot_dimension_numbers<[1], [0], [0], [1], [0, 0, 1, 1], [], []>} : vector<256x12xf32>, vector<12x128xf32>, vector<256x128xf32> -> vector<256x128xf32>
    %25 = arith.addf %17, %24 : vector<256x128xf32>
    %c0_18 = arith.constant 0 : index
    %c0_19 = arith.constant 0 : index
    %26 = vector.load %arg5[%c0_18, %c0_19] : memref<1x128xf32, #tpu.memory_space<vmem>>, vector<1x128xf32>
    %27 = vector.broadcast %26 : vector<1x128xf32> to vector<256x128xf32>
    %28 = arith.addf %25, %27 : vector<256x128xf32>
    %29 = vector.shape_cast %28 : vector<256x128xf32> to vector<1x16x16x128xf32>
    %c0_20 = arith.constant 0 : index
    %c0_21 = arith.constant 0 : index
    %c0_22 = arith.constant 0 : index
    %c0_23 = arith.constant 0 : index
    %30 = vector.load %arg6[%c0_20, %c0_21, %c0_22, %c0_23] : memref<1x16x16x128xf32, #tpu.memory_space<vmem>>, vector<1x16x16x128xf32>
    %31 = arith.addf %29, %30 : vector<1x16x16x128xf32>
    %cst_24 = arith.constant 0.000000e+00 : f32
    %cst_25 = arith.constant 6.000000e+00 : f32
    %32 = vector.broadcast %cst_24 : f32 to vector<1x16x16x128xf32>
    %33 = arith.maximumf %32, %31 : vector<1x16x16x128xf32>
    %34 = vector.broadcast %cst_25 : f32 to vector<1x16x16x128xf32>
    %35 = arith.minimumf %34, %33 : vector<1x16x16x128xf32>
    %c0_26 = arith.constant 0 : index
    %c0_27 = arith.constant 0 : index
    %c0_28 = arith.constant 0 : index
    %c0_29 = arith.constant 0 : index
    %36 = vector.load %arg7[%c0_26, %c0_27, %c0_28, %c0_29] : memref<1x16x16x128xf32, #tpu.memory_space<vmem>>, vector<1x16x16x128xf32>
    tpu.vector_store %arg7[%c0_26, %c0_27, %c0_28, %c0_29], %35 {strides = array<i32>} : memref<1x16x16x128xf32, #tpu.memory_space<vmem>>, vector<1x16x16x128xf32>,
    return
  }
  func.func @transform_0(%arg0: i32, %arg1: i32, %arg2: i32) -> (i32, i32, i32, i32) {
    %c0_i32 = arith.constant 0 : i32
    %c0_i32_0 = arith.constant 0 : i32
    %c0_i32_1 = arith.constant 0 : i32
    %c0_i32_2 = arith.constant 0 : i32
    return %arg0, %c0_i32, %c0_i32_0, %c0_i32_1 : i32, i32, i32, i32
  }
  func.func @transform_1(%arg0: i32, %arg1: i32, %arg2: i32) -> (i32, i32, i32) {
    %c0_i32 = arith.constant 0 : i32
    %c0_i32_0 = arith.constant 0 : i32
    %c0_i32_1 = arith.constant 0 : i32
    return %c0_i32, %c0_i32_0, %arg1 : i32, i32, i32
  }
  func.func @transform_2(%arg0: i32, %arg1: i32, %arg2: i32) -> (i32, i32) {
    %c0_i32 = arith.constant 0 : i32
    %c0_i32_0 = arith.constant 0 : i32
    return %c0_i32, %arg1 : i32, i32
  }
  func.func @transform_3(%arg0: i32, %arg1: i32, %arg2: i32) -> (i32, i32, i32, i32) {
    %c0_i32 = arith.constant 0 : i32
    %c0_i32_0 = arith.constant 0 : i32
    return %arg0, %arg2, %c0_i32, %arg1 : i32, i32, i32, i32
  }
  func.func @transform_4(%arg0: i32, %arg1: i32, %arg2: i32) -> (i32, i32, i32, i32) {
    %c0_i32 = arith.constant 0 : i32
    %c0_i32_0 = arith.constant 0 : i32
    return %arg0, %arg2, %c0_i32, %arg1 : i32, i32, i32, i32
  }
}

</mosaic_0001>

<bundles_post_ra>
// kernel: conv_bn_add_relu6.1
= control target key start
LH: loop header
LB: loop body
LE: loop exit
PB: predicated region body
PF: predicated region fallthrough
CT: control target
= control target key end

     0   :  { %s2400_s15 = smov 0   ;;  %s2402_s16 = smov 0   ;;  %s2741_s0 = inlined_call_operand.vmem [shape: f32[2,18,16,12], index: 0, kind: input, shape index: {}]   ;;  %s2742_s1 = inlined_call_operand.vmem [shape: f32[3,12,128], index: 1, kind: input, shape index: {}]   ;;  %s2743_s2 = inlined_call_operand.vmem [shape: f32[1,128], index: 2, kind: input, shape index: {}]   ;;  %s2744_s3 = inlined_call_operand.vmem [shape: f32[2,16,16,128], index: 3, kind: input, shape index: {}]   ;;  %s2745_s4 = inlined_call_operand.vmem [shape: f32[2,16,16,128], index: 4, kind: output, shape index: {}]  }
   0x1   :  { %s2404_s17 = smov 0  }
   0x2 LB: > { %s33_s18 = sadd.s32 1, %s2368_s16  ;;  %p1804_p0 = scmp.ge.s32.totalorder %s2372_s17, 1  ;;  %s2372_s17 = sphi %s2404_s17, %s14_s17   ;;  %s2368_s16 = sphi %s2402_s16, %s2749_s16   ;;  %s2364_s15 = sphi %s2400_s15, %s2748_s15  }
   0x3   : > { %p35_p1 = scmp.ge.s32.totalorder %s33_s18, 2  ;;  %p225_p2 = scmp.lt.s32.totalorder %s2372_s17, 3 }
   0x5   : > { %s2751_s18 = smov (%p35_p1, %s33_s18), 0  ;;  %p226_p3 = pnand %p1804_p0, %p225_p2 }
   0x6   : > { %v1842_v0 = vld [vmem:[%s2742_s1 + $0x10] sm:$0xff] (!%p226_p3)  ;;  %v1843_v1 = vld [vmem:[%s2742_s1 + $0x18] sm:$0xf] (!%p226_p3)  ;;  %vm491_vm0 = vcmask (!%p226_p3), 1043456   ;;  %v354_v2 = vld [vmem:[%s2742_s1] sm:$0xff] (!%p226_p3)  ;;  %vm2374_vm1 = vmmov (!%p226_p3), 1  }
   0x7   : > { %229 = sbr.rel (%p226_p3) target bundleno = 336 (0x150), region = 36  ;;  %v2240_v3 = vpack.c.bf16 (!%p226_p3), %v1843_v1, %v1842_v0  ;;  %vm2427_vm2 = vmpackc.low (!%p226_p3), %vm491_vm0, %vm2374_vm1  ;;  %v355_v5 = vld [vmem:[%s2742_s1 + $0x8] sm:$0xf] (!%p226_p3)  ;;  %p279_p4 = scmp.lt.s32.totalorder (!%p226_p3), %s2364_s15, 1  ;;  %v1942_v6 = vld [vmem:[%s2742_s1 + $0x20] sm:$0xff] (!%p226_p3)  ;;  %vm394_vm3 = vcmask (!%p226_p3), 97280  }
   0x8   : > { %v2246_v7 = vpack.c.bf16 (!%p226_p3), %v355_v5, %v354_v2  ;;  %v1943_v8 = vld [vmem:[%s2742_s1 + $0x28] sm:$0xf] (!%p226_p3)  ;;  %v2621_v63 = vld [vmem:[%s2743_s2] ss:$0 sm:$0xff] (!%p226_p3) }
   0x9   : > { %2242 = vmatprep.subr.msk.bf16.mxu1 (!%p226_p3), %vm2427_vm2, %v2240_v3  ;;  %v2252_v9 = vpack.c.bf16 (!%p226_p3), %v1943_v8, %v1942_v6 }
   0xa   : > { %2248 = vmatprep.subr.msk.bf16.mxu0 (!%p226_p3), %vm2427_vm2, %v2246_v7  ;;  %2245 = vmatpush3.bf16.msk.msra.mxu1 (!%p226_p3), %vm2427_vm2, %v2240_v3 }
   0xb   : > { %2251 = vmatpush3.bf16.msk.msra.mxu0 (!%p226_p3), %vm2427_vm2, %v2246_v7  ;;  %2258 = vmatprep.subr.msk.bf16.mxu1 (!%p226_p3), %vm2427_vm2, %v2246_v7 }
   0xc   : > { %2254 = vmatprep.subr.msk.bf16.mxu0 (!%p226_p3), %vm2427_vm2, %v2252_v9 }
   0xe   : > { %s2753_s15 = smov (!%p279_p4, %s2364_s15), 1 }
   0xf   : > { %s2324_s5 = smul.u32 288, %s2753_s15  ;;  %s1980_s9 = sshll.u32 %s2753_s15, 8 }
  0x10   : > { %s2616_s12 = scalar_lea.vmem %s2744_s3, %s1980_s9  ;;  %s2633_s20 = scalar_lea.vmem %s2745_s4, %s1980_s9 }
  0x11   : > { %s2458_s8 = scalar_lea.vmem %s2741_s0, %s2324_s5  ;;  %v1478_v2 = vld [vmem:[%s2616_s12 + $0x8] sm:$0xff]  ;;  %v1477_v5 = vld [vmem:[%s2616_s12] sm:$0xff] }
  0x12   : > { %v1810_v10 = vld [vmem:[%s2458_s8 + $0x10] sm:$0xff]  ;;  %v322_v11 = vld [vmem:[%s2458_s8] sm:$0xff]  ;;  %v1811_v12 = vld [vmem:[%s2458_s8 + $0x18] sm:$0xff] }
  0x13   : > { %2088 = vmatprep.mubr.msk.f32.mxu1 %vm394_vm3, %v1810_v10  ;;  %2140 = vmatprep.mubr.msk.f32.mxu0 %vm394_vm3, %v322_v11  ;;  %v323_v13 = vld [vmem:[%s2458_s8 + $0x8] sm:$0xff]  ;;  %v1812_v14 = vld [vmem:[%s2458_s8 + $0x20] sm:$0xff]  ;;  %v1814_v16 = vld [vmem:[%s2458_s8 + $0x30] sm:$0xff] }
  0x14   : > { %2089 = vmatmul.mubr.msk.f32.vlgmr.msra.gmra.mrb[0].mxu1 %vm394_vm3, %v1811_v12  ;;  %2141 = vmatmul.mubr.msk.f32.vlgmr.msra.gmra.mrb[0].mxu0 %vm394_vm3, %v323_v13  ;;  %v1813_v15 = vld [vmem:[%s2458_s8 + $0x28] sm:$0xff]  ;;  %v1815_v17 = vld [vmem:[%s2458_s8 + $0x38] sm:$0xff]  ;;  %v1816_v18 = vld [vmem:[%s2458_s8 + $0x40] sm:$0xff] }
  0x15   : > { %2259 = vmatpush3.bf16.msk.msra.mxu1 %vm2427_vm2, %v2246_v7  ;;  %2257 = vmatpush3.bf16.msk.msra.mxu0 %vm2427_vm2, %v2252_v9  ;;  %v1817_v19 = vld [vmem:[%s2458_s8 + $0x48] sm:$0xff]  ;;  %v1818_v20 = vld [vmem:[%s2458_s8 + $0x50] sm:$0xff]  ;;  %v1819_v21 = vld [vmem:[%s2458_s8 + $0x58] sm:$0xff] }
  0x16   : > { %2091 = vmatprep.mubr.msk.f32.mxu1 %vm394_vm3, %v1812_v14  ;;  %2143 = vmatprep.mubr.msk.f32.mxu0 %vm394_vm3, %v1810_v10  ;;  %v1820_v22 = vld [vmem:[%s2458_s8 + $0x60] sm:$0xff]  ;;  %v1821_v23 = vld [vmem:[%s2458_s8 + $0x68] sm:$0xff]  ;;  %v1822_v24 = vld [vmem:[%s2458_s8 + $0x70] sm:$0xff] }
  0x17   : > { %v1823_v25 = vld [vmem:[%s2458_s8 + $0x78] sm:$0xff]  ;;  %v1824_v26 = vld [vmem:[%s2458_s8 + $0x80] sm:$0xff]  ;;  %v1825_v27 = vld [vmem:[%s2458_s8 + $0x88] sm:$0xff] }
  0x18   : > { %2092 = vmatmul.mubr.msk.f32.gmra.mrb[2].mxu1 %vm394_vm3, %v1813_v15  ;;  %2144 = vmatmul.mubr.msk.f32.gmra.mrb[2].mxu0 %vm394_vm3, %v1811_v12  ;;  %v1826_v28 = vld [vmem:[%s2458_s8 + $0x90] sm:$0xff]  ;;  %v1827_v29 = vld [vmem:[%s2458_s8 + $0x98] sm:$0xff]  ;;  %v1828_v30 = vld [vmem:[%s2458_s8 + $0xa0] sm:$0xff] }
  0x19   : > { %2094 = vmatprep.mubr.msk.f32.mxu1 %vm394_vm3, %v1814_v16  ;;  %2146 = vmatprep.mubr.msk.f32.mxu0 %vm394_vm3, %v1812_v14  ;;  %v1829_v31 = vld [vmem:[%s2458_s8 + $0xa8] sm:$0xff]  ;;  %v1830_v32 = vld [vmem:[%s2458_s8 + $0xb0] sm:$0xff]  ;;  %v1831_v33 = vld [vmem:[%s2458_s8 + $0xb8] sm:$0xff] }
  0x1a   : > { %v1832_v34 = vld [vmem:[%s2458_s8 + $0xc0] sm:$0xff]  ;;  %v1833_v35 = vld [vmem:[%s2458_s8 + $0xc8] sm:$0xff]  ;;  %v1834_v36 = vld [vmem:[%s2458_s8 + $0xd0] sm:$0xff] }
  0x1b   : > { %v1835_v37 = vld [vmem:[%s2458_s8 + $0xd8] sm:$0xff]  ;;  %v1836_v38 = vld [vmem:[%s2458_s8 + $0xe0] sm:$0xff]  ;;  %v1837_v39 = vld [vmem:[%s2458_s8 + $0xe8] sm:$0xff] }
  0x1c   : > { %2095 = vmatmul.mubr.msk.f32.gmra.mrb[4].mxu1 %vm394_vm3, %v1815_v17  ;;  %2147 = vmatmul.mubr.msk.f32.gmra.mrb[4].mxu0 %vm394_vm3, %v1813_v15  ;;  %v1838_v40 = vld [vmem:[%s2458_s8 + $0xf0] sm:$0xff]  ;;  %v1839_v41 = vld [vmem:[%s2458_s8 + $0xf8] sm:$0xff]  ;;  %v1840_v42 = vld [vmem:[%s2458_s8 + $0x100] sm:$0xff] }
  0x1d   : > { %2097 = vmatprep.mubr.msk.f32.mxu1 %vm394_vm3, %v1816_v18  ;;  %2149 = vmatprep.mubr.msk.f32.mxu0 %vm394_vm3, %v1814_v16  ;;  %v1841_v43 = vld [vmem:[%s2458_s8 + $0x108] sm:$0xff]  ;;  %v1940_v44 = vld [vmem:[%s2458_s8 + $0x110] sm:$0xff]  ;;  %v1941_v45 = vld [vmem:[%s2458_s8 + $0x118] sm:$0xff] }
  0x1e   : > { %v1480_v12 = vld [vmem:[%s2616_s12 + $0x18] sm:$0xff] }
  0x20   : > { %2098 = vmatmul.mubr.msk.f32.gmra.mrb[6].mxu1 %vm394_vm3, %v1817_v19  ;;  %2150 = vmatmul.mubr.msk.f32.gmra.mrb[6].mxu0 %vm394_vm3, %v1815_v17 }
  0x21   : > { %2100 = vmatprep.mubr.msk.f32.mxu1 %vm394_vm3, %v1818_v20  ;;  %2152 = vmatprep.mubr.msk.f32.mxu0 %vm394_vm3, %v1816_v18 }
  0x24   : > { %2101 = vmatmul.mubr.msk.f32.gmra.mrb[8].mxu1 %vm394_vm3, %v1819_v21  ;;  %2153 = vmatmul.mubr.msk.f32.gmra.mrb[8].mxu0 %vm394_vm3, %v1817_v19 }
  0x25   : > { %2103 = vmatprep.mubr.msk.f32.mxu1 %vm394_vm3, %v1820_v22  ;;  %2155 = vmatprep.mubr.msk.f32.mxu0 %vm394_vm3, %v1818_v20 }
  0x28   : > { %2104 = vmatmul.mubr.msk.f32.gmra.mrb[10].mxu1 %vm394_vm3, %v1821_v23  ;;  %2156 = vmatmul.mubr.msk.f32.gmra.mrb[10].mxu0 %vm394_vm3, %v1819_v21 }
  0x29   : > { %2106 = vmatprep.mubr.msk.f32.mxu1 %vm394_vm3, %v1822_v24  ;;  %2158 = vmatprep.mubr.msk.f32.mxu0 %vm394_vm3, %v1820_v22 }
  0x2c   : > { %2107 = vmatmul.mubr.msk.f32.gmra.mrb[12].mxu1 %vm394_vm3, %v1823_v25  ;;  %2159 = vmatmul.mubr.msk.f32.gmra.mrb[12].mxu0 %vm394_vm3, %v1821_v23 }
  0x2d   : > { %2109 = vmatprep.mubr.msk.f32.mxu1 %vm394_vm3, %v1824_v26  ;;  %2161 = vmatprep.mubr.msk.f32.mxu0 %vm394_vm3, %v1822_v24 }
  0x30   : > { %2110 = vmatmul.mubr.msk.f32.gmra.mrb[14].mxu1 %vm394_vm3, %v1825_v27  ;;  %2162 = vmatmul.mubr.msk.f32.gmra.mrb[14].mxu0 %vm394_vm3, %v1823_v25 }
  0x31   : > { %2112 = vmatprep.mubr.msk.f32.mxu1 %vm394_vm3, %v1826_v28  ;;  %2192 = vmatprep.mubr.msk.f32.mxu0 %vm394_vm3, %v1812_v14 }
  0x34   : > { %2113 = vmatmul.mubr.msk.f32.gmra.mrb[16].mxu1 %vm394_vm3, %v1827_v29  ;;  %2193 = vmatmul.mubr.msk.f32.vlgmr.msra.gmra.mrb[0].mxu0 %vm394_vm3, %v1813_v15 }
  0x35   : > { %2115 = vmatprep.mubr.msk.f32.mxu1 %vm394_vm3, %v1828_v30  ;;  %2195 = vmatprep.mubr.msk.f32.mxu0 %vm394_vm3, %v1814_v16  ;;  %v1479_v16 = vld [vmem:[%s2616_s12 + $0x10] sm:$0xff] }
  0x38   : > { %2116 = vmatmul.mubr.msk.f32.gmra.mrb[18].mxu1 %vm394_vm3, %v1829_v31  ;;  %2196 = vmatmul.mubr.msk.f32.gmra.mrb[2].mxu0 %vm394_vm3, %v1815_v17 }
  0x39   : > { %2118 = vmatprep.mubr.msk.f32.mxu1 %vm394_vm3, %v1830_v32  ;;  %2198 = vmatprep.mubr.msk.f32.mxu0 %vm394_vm3, %v1816_v18 }
  0x3c   : > { %2119 = vmatmul.mubr.msk.f32.gmra.mrb[20].mxu1 %vm394_vm3, %v1831_v33  ;;  %2199 = vmatmul.mubr.msk.f32.gmra.mrb[4].mxu0 %vm394_vm3, %v1817_v19 }
  0x3d   : > { %2121 = vmatprep.mubr.msk.f32.mxu1 %vm394_vm3, %v1832_v34  ;;  %2201 = vmatprep.mubr.msk.f32.mxu0 %vm394_vm3, %v1818_v20 }
  0x40   : > { %2122 = vmatmul.mubr.msk.f32.gmra.mrb[22].mxu1 %vm394_vm3, %v1833_v35  ;;  %2202 = vmatmul.mubr.msk.f32.gmra.mrb[6].mxu0 %vm394_vm3, %v1819_v21 }
  0x41   : > { %2124 = vmatprep.mubr.msk.f32.mxu1 %vm394_vm3, %v1834_v36  ;;  %2204 = vmatprep.mubr.msk.f32.mxu0 %vm394_vm3, %v1820_v22 }
  0x44   : > { %2125 = vmatmul.mubr.msk.f32.gmra.mrb[24].mxu1 %vm394_vm3, %v1835_v37  ;;  %2205 = vmatmul.mubr.msk.f32.gmra.mrb[8].mxu0 %vm394_vm3, %v1821_v23 }
  0x45   : > { %2127 = vmatprep.mubr.msk.f32.mxu1 %vm394_vm3, %v1836_v38  ;;  %2207 = vmatprep.mubr.msk.f32.mxu0 %vm394_vm3, %v1822_v24 }
  0x48   : > { %2128 = vmatmul.mubr.msk.f32.gmra.mrb[26].mxu1 %vm394_vm3, %v1837_v39  ;;  %2208 = vmatmul.mubr.msk.f32.gmra.mrb[10].mxu0 %vm394_vm3, %v1823_v25 }
  0x49   : > { %2130 = vmatprep.mubr.msk.f32.mxu1 %vm394_vm3, %v1838_v40  ;;  %2210 = vmatprep.mubr.msk.f32.mxu0 %vm394_vm3, %v1824_v26 }
  0x4c   : > { %2131 = vmatmul.mubr.msk.f32.gmra.mrb[28].mxu1 %vm394_vm3, %v1839_v41  ;;  %2211 = vmatmul.mubr.msk.f32.gmra.mrb[12].mxu0 %vm394_vm3, %v1825_v27 }
  0x4d   : > { %2133 = vmatprep.mubr.msk.f32.mxu1 %vm394_vm3, %v1840_v42  ;;  %2213 = vmatprep.mubr.msk.f32.mxu0 %vm394_vm3, %v1826_v28 }
  0x50   : > { %2134 = vmatmul.mubr.msk.f32.gmra.mrb[30].mxu1 %vm394_vm3, %v1841_v43  ;;  %2214 = vmatmul.mubr.msk.f32.gmra.mrb[14].mxu0 %vm394_vm3, %v1827_v29 }
  0x51   : > { %2164 = vmatprep.mubr.msk.f32.mxu1 %vm394_vm3, %v1824_v26  ;;  %2216 = vmatprep.mubr.msk.f32.mxu0 %vm394_vm3, %v1828_v30  ;;  %v1482_v26 = vld [vmem:[%s2616_s12 + $0x28] sm:$0xff] }
  0x54   : > { %2165 = vmatmul.mubr.msk.f32.vlgmr.msra.gmra.mrb[16].mxu1 %vm394_vm3, %v1825_v27  ;;  %2217 = vmatmul.mubr.msk.f32.gmra.mrb[16].mxu0 %vm394_vm3, %v1829_v31 }
  0x55   : > { %2167 = vmatprep.mubr.msk.f32.mxu1 %vm394_vm3, %v1826_v28  ;;  %2219 = vmatprep.mubr.msk.f32.mxu0 %vm394_vm3, %v1830_v32 }
  0x58   : > { %2168 = vmatmul.mubr.msk.f32.gmra.mrb[18].mxu1 %vm394_vm3, %v1827_v29  ;;  %2220 = vmatmul.mubr.msk.f32.gmra.mrb[18].mxu0 %vm394_vm3, %v1831_v33 }
  0x59   : > { %2170 = vmatprep.mubr.msk.f32.mxu1 %vm394_vm3, %v1828_v30  ;;  %2222 = vmatprep.mubr.msk.f32.mxu0 %vm394_vm3, %v1832_v34  ;;  %v1481_v30 = vld [vmem:[%s2616_s12 + $0x20] sm:$0xff] }
  0x5c   : > { %2171 = vmatmul.mubr.msk.f32.gmra.mrb[20].mxu1 %vm394_vm3, %v1829_v31  ;;  %2223 = vmatmul.mubr.msk.f32.gmra.mrb[20].mxu0 %vm394_vm3, %v1833_v35 }
  0x5d   : > { %2173 = vmatprep.mubr.msk.f32.mxu1 %vm394_vm3, %v1830_v32  ;;  %2225 = vmatprep.mubr.msk.f32.mxu0 %vm394_vm3, %v1834_v36 }
  0x60   : > { %2174 = vmatmul.mubr.msk.f32.gmra.mrb[22].mxu1 %vm394_vm3, %v1831_v33  ;;  %2226 = vmatmul.mubr.msk.f32.gmra.mrb[22].mxu0 %vm394_vm3, %v1835_v37 }
  0x61   : > { %2176 = vmatprep.mubr.msk.f32.mxu1 %vm394_vm3, %v1832_v34  ;;  %2228 = vmatprep.mubr.msk.f32.mxu0 %vm394_vm3, %v1836_v38 }
  0x64   : > { %2177 = vmatmul.mubr.msk.f32.gmra.mrb[24].mxu1 %vm394_vm3, %v1833_v35  ;;  %2229 = vmatmul.mubr.msk.f32.gmra.mrb[24].mxu0 %vm394_vm3, %v1837_v39 }
  0x65   : > { %2179 = vmatprep.mubr.msk.f32.mxu1 %vm394_vm3, %v1834_v36  ;;  %2231 = vmatprep.mubr.msk.f32.mxu0 %vm394_vm3, %v1838_v40 }
  0x68   : > { %2180 = vmatmul.mubr.msk.f32.gmra.mrb[26].mxu1 %vm394_vm3, %v1835_v37  ;;  %2232 = vmatmul.mubr.msk.f32.gmra.mrb[26].mxu0 %vm394_vm3, %v1839_v41 }
  0x69   : > { %2182 = vmatprep.mubr.msk.f32.mxu1 %vm394_vm3, %v1836_v38  ;;  %2234 = vmatprep.mubr.msk.f32.mxu0 %vm394_vm3, %v1840_v42 }
  0x6c   : > { %2183 = vmatmul.mubr.msk.f32.gmra.mrb[28].mxu1 %vm394_vm3, %v1837_v39  ;;  %2235 = vmatmul.mubr.msk.f32.gmra.mrb[28].mxu0 %vm394_vm3, %v1841_v43 }
  0x6d   : > { %2185 = vmatprep.mubr.msk.f32.mxu1 %vm394_vm3, %v1838_v40  ;;  %2237 = vmatprep.mubr.msk.f32.mxu0 %vm394_vm3, %v1940_v44  ;;  %v1484_v40 = vld [vmem:[%s2616_s12 + $0x38] sm:$0xff]  ;;  %v1483_v44 = vld [vmem:[%s2616_s12 + $0x30] sm:$0xff] }
  0x70   : > { %2186 = vmatmul.mubr.msk.f32.gmra.mrb[30].mxu1 %vm394_vm3, %v1839_v41  ;;  %2238 = vmatmul.mubr.msk.f32.gmra.mrb[30].mxu0 %vm394_vm3, %v1941_v45 }
  0xe7   : > { %v2090_v46 = vpop.f32.mrb[0].mxu1 }
  0xe8   : > { %v561_v47 = vpop.f32.mrb[1].mxu1 }
  0xeb   : > { %v2093_v48 = vpop.f32.mrb[2].mxu1 }
  0xec   : > { %v571_v49 = vpop.f32.mrb[3].mxu1 }
  0xef   : > { %v2096_v50 = vpop.f32.mrb[4].mxu1 }
  0xf0   : > { %v581_v51 = vpop.f32.mrb[5].mxu1 }
  0xf3   : > { %v2099_v52 = vpop.f32.mrb[6].mxu1 }
  0xf4   : > { %v591_v53 = vpop.f32.mrb[7].mxu1 }
  0xf7   : > { %v2596_v54 = vpop.f32.mrb[8].mxu1 }
  0xf8   : > { %v2598_v55 = vpop.f32.mrb[9].mxu1 }
  0xfb   : > { %v2600_v56 = vpop.f32.mrb[10].mxu1 }
  0xfc   : > { %v2602_v57 = vpop.f32.mrb[11].mxu1 }
  0xff   : > { %v2604_v58 = vpop.f32.mrb[12].mxu1 }
 0x100   : > { %v2606_v59 = vpop.f32.mrb[13].mxu1 }
 0x103   : > { %v2608_v60 = vpop.f32.mrb[14].mxu1 }
 0x104   : > { %v2611_v61 = vpop.f32.mrb[15].mxu1 }
 0x107   : > { %v2194_v62 = vpop.f32.mrb[0].mxu0 }
 0x108   : > { %v2260_v0 = vadd.f32 %v2194_v62, %v2090_v46  ;;  %v1247_v1 = vpop.f32.mrb[1].mxu0  ;;  %v1486_v62 = vld [vmem:[%s2616_s12 + $0x48] sm:$0xff] }
 0x109   : > { %v2261_v3 = vadd.f32 %v1247_v1, %v561_v47 }
 0x10a   : > { %v1446_v4 = vadd.f32 %v2260_v0, %v2621_v63 }
 0x10b   : > { %v1445_v6 = vadd.f32 %v2261_v3, %v2621_v63  ;;  %v2197_v7 = vpop.f32.mrb[2].mxu0  ;;  %v1485_v3 = vld [vmem:[%s2616_s12 + $0x40] sm:$0xff] }
 0x10c   : > { %v1510_v8 = vadd.f32 %v1478_v2, %v1446_v4  ;;  %v2262_v9 = vadd.f32 %v2197_v7, %v2093_v48  ;;  %v1257_v10 = vpop.f32.mrb[3].mxu0 }
 0x10d   : > { %v1509_v11 = vadd.f32 %v1477_v5, %v1445_v6  ;;  %v2263_v13 = vadd.f32 %v1257_v10, %v571_v49 }
 0x10e   : > { %v1542_v14 = vmax.f32 %v1510_v8, 0.0  ;;  %v1448_v15 = vadd.f32 %v2262_v9, %v2621_v63 }
 0x10f   : > { %v1541_v17 = vmax.f32 %v1509_v11, 0.0  ;;  %v1447_v18 = vadd.f32 %v2263_v13, %v2621_v63  ;;  %v2200_v19 = vpop.f32.mrb[4].mxu0  ;;  %v1488_v11 = vld [vmem:[%s2616_s12 + $0x58] sm:$0xff] }
 0x110   : > { %v1574_v20 = vmin.f32 %v1542_v14, 6.0  ;;  %v1512_v21 = vadd.f32 %v1480_v12, %v1448_v15  ;;  %v2264_v22 = vadd.f32 %v2200_v19, %v2096_v50  ;;  %v1267_v23 = vpop.f32.mrb[5].mxu0  ;;  %v1487_v15 = vld [vmem:[%s2616_s12 + $0x50] sm:$0xff] }
 0x111   : > { %v1573_v24 = vmin.f32 %v1541_v17, 6.0  ;;  %v1511_v25 = vadd.f32 %v1479_v16, %v1447_v18  ;;  %v2265_v27 = vadd.f32 %v1267_v23, %v581_v51  ;;  %v1490_v23 = vld [vmem:[%s2616_s12 + $0x68] sm:$0xff] }
 0x112   : > { %1606 = vst [vmem:[%s2633_s20 + $0x8] sm:$0xff] %v1574_v20  ;;  %v1544_v28 = vmax.f32 %v1512_v21, 0.0  ;;  %v1450_v29 = vadd.f32 %v2264_v22, %v2621_v63 }
 0x113   : > { %1605 = vst [vmem:[%s2633_s20] sm:$0xff] %v1573_v24  ;;  %v1543_v31 = vmax.f32 %v1511_v25, 0.0  ;;  %v1449_v32 = vadd.f32 %v2265_v27, %v2621_v63  ;;  %v2203_v33 = vpop.f32.mrb[6].mxu0  ;;  %v1489_v27 = vld [vmem:[%s2616_s12 + $0x60] sm:$0xff] }
 0x114   : > { %v1576_v34 = vmin.f32 %v1544_v28, 6.0  ;;  %v1514_v35 = vadd.f32 %v1482_v26, %v1450_v29  ;;  %v2266_v36 = vadd.f32 %v2203_v33, %v2099_v52  ;;  %v1277_v37 = vpop.f32.mrb[7].mxu0 }
 0x115   : > { %v1575_v38 = vmin.f32 %v1543_v31, 6.0  ;;  %v1513_v39 = vadd.f32 %v1481_v30, %v1449_v32  ;;  %v2267_v41 = vadd.f32 %v1277_v37, %v591_v53 }
 0x116   : > { %1608 = vst [vmem:[%s2633_s20 + $0x18] sm:$0xff] %v1576_v34  ;;  %v1546_v42 = vmax.f32 %v1514_v35, 0.0  ;;  %v1452_v43 = vadd.f32 %v2266_v36, %v2621_v63  ;;  %v1492_v35 = vld [vmem:[%s2616_s12 + $0x78] sm:$0xff] }
 0x117   : > { %1607 = vst [vmem:[%s2633_s20 + $0x10] sm:$0xff] %v1575_v38  ;;  %v1545_v45 = vmax.f32 %v1513_v39, 0.0  ;;  %v1451_v46 = vadd.f32 %v2267_v41, %v2621_v63  ;;  %v2206_v47 = vpop.f32.mrb[8].mxu0  ;;  %v1491_v39 = vld [vmem:[%s2616_s12 + $0x70] sm:$0xff] }
 0x118   : > { %v1578_v48 = vmin.f32 %v1546_v42, 6.0  ;;  %v1516_v49 = vadd.f32 %v1484_v40, %v1452_v43  ;;  %v2268_v50 = vadd.f32 %v2206_v47, %v2596_v54  ;;  %v1287_v51 = vpop.f32.mrb[9].mxu0 }
 0x119   : > { %v1577_v52 = vmin.f32 %v1545_v45, 6.0  ;;  %v1515_v53 = vadd.f32 %v1483_v44, %v1451_v46  ;;  %v2269_v0 = vadd.f32 %v1287_v51, %v2598_v55 }
 0x11a   : > { %1610 = vst [vmem:[%s2633_s20 + $0x28] sm:$0xff] %v1578_v48  ;;  %v1548_v1 = vmax.f32 %v1516_v49, 0.0  ;;  %v1454_v2 = vadd.f32 %v2268_v50, %v2621_v63  ;;  %v1494_v49 = vld [vmem:[%s2616_s12 + $0x88] sm:$0xff] }
 0x11b   : > { %1609 = vst [vmem:[%s2633_s20 + $0x20] sm:$0xff] %v1577_v52  ;;  %v1547_v4 = vmax.f32 %v1515_v53, 0.0  ;;  %v1453_v5 = vadd.f32 %v2269_v0, %v2621_v63  ;;  %v2209_v54 = vpop.f32.mrb[10].mxu0  ;;  %v1493_v53 = vld [vmem:[%s2616_s12 + $0x80] sm:$0xff] }
 0x11c   : > { %v1580_v6 = vmin.f32 %v1548_v1, 6.0  ;;  %v1518_v7 = vadd.f32 %v1486_v62, %v1454_v2  ;;  %v2270_v8 = vadd.f32 %v2209_v54, %v2600_v56  ;;  %v1297_v9 = vpop.f32.mrb[11].mxu0 }
 0x11d   : > { %v1579_v10 = vmin.f32 %v1547_v4, 6.0  ;;  %v1517_v55 = vadd.f32 %v1485_v3, %v1453_v5  ;;  %v2271_v12 = vadd.f32 %v1297_v9, %v2602_v57  ;;  %v1496_v9 = vld [vmem:[%s2616_s12 + $0x98] sm:$0xff] }
 0x11e   : > { %1612 = vst [vmem:[%s2633_s20 + $0x38] sm:$0xff] %v1580_v6  ;;  %v1550_v13 = vmax.f32 %v1518_v7, 0.0  ;;  %v1456_v14 = vadd.f32 %v2270_v8, %v2621_v63 }
 0x11f   : > { %1611 = vst [vmem:[%s2633_s20 + $0x30] sm:$0xff] %v1579_v10  ;;  %v1549_v16 = vmax.f32 %v1517_v55, 0.0  ;;  %v1455_v17 = vadd.f32 %v2271_v12, %v2621_v63  ;;  %v2212_v56 = vpop.f32.mrb[12].mxu0  ;;  %v1495_v12 = vld [vmem:[%s2616_s12 + $0x90] sm:$0xff] }
 0x120   : > { %v1582_v18 = vmin.f32 %v1550_v13, 6.0  ;;  %v1520_v19 = vadd.f32 %v1488_v11, %v1456_v14  ;;  %v2272_v20 = vadd.f32 %v2212_v56, %v2604_v58  ;;  %v1307_v21 = vpop.f32.mrb[13].mxu0 }
 0x121   : > { %v1581_v22 = vmin.f32 %v1549_v16, 6.0  ;;  %v1519_v57 = vadd.f32 %v1487_v15, %v1455_v17  ;;  %v2273_v24 = vadd.f32 %v1307_v21, %v2606_v59 }
 0x122   : > { %1614 = vst [vmem:[%s2633_s20 + $0x48] sm:$0xff] %v1582_v18  ;;  %v1552_v25 = vmax.f32 %v1520_v19, 0.0  ;;  %v1458_v26 = vadd.f32 %v2272_v20, %v2621_v63 }
 0x123   : > { %1613 = vst [vmem:[%s2633_s20 + $0x40] sm:$0xff] %v1581_v22  ;;  %v1551_v28 = vmax.f32 %v1519_v57, 0.0  ;;  %v1457_v29 = vadd.f32 %v2273_v24, %v2621_v63  ;;  %v2215_v58 = vpop.f32.mrb[14].mxu0  ;;  %v1498_v57 = vld [vmem:[%s2616_s12 + $0xa8] sm:$0xff] }
 0x124   : > { %v1584_v30 = vmin.f32 %v1552_v25, 6.0  ;;  %v1522_v31 = vadd.f32 %v1490_v23, %v1458_v26  ;;  %v2274_v32 = vadd.f32 %v2215_v58, %v2608_v60  ;;  %v1317_v33 = vpop.f32.mrb[15].mxu0  ;;  %v1497_v26 = vld [vmem:[%s2616_s12 + $0xa0] sm:$0xff] }
 0x125   : > { %v1583_v34 = vmin.f32 %v1551_v28, 6.0  ;;  %v1521_v59 = vadd.f32 %v1489_v27, %v1457_v29  ;;  %v2275_v36 = vadd.f32 %v1317_v33, %v2611_v61 }
 0x126   : > { %1616 = vst [vmem:[%s2633_s20 + $0x58] sm:$0xff] %v1584_v30  ;;  %v1554_v37 = vmax.f32 %v1522_v31, 0.0  ;;  %v1460_v38 = vadd.f32 %v2274_v32, %v2621_v63 }
 0x127   : > { %1615 = vst [vmem:[%s2633_s20 + $0x50] sm:$0xff] %v1583_v34  ;;  %v1553_v40 = vmax.f32 %v1521_v59, 0.0  ;;  %v1459_v41 = vadd.f32 %v2275_v36, %v2621_v63  ;;  %v2166_v60 = vpop.f32.mrb[16].mxu1  ;;  %v2218_v42 = vpop.f32.mrb[16].mxu0  ;;  %v1500_v36 = vld [vmem:[%s2616_s12 + $0xb8] sm:$0xff] }
 0x128   : > { %v1586_v43 = vmin.f32 %v1554_v37, 6.0  ;;  %v1524_v44 = vadd.f32 %v1492_v35, %v1460_v38  ;;  %v2276_v45 = vadd.f32 %v2218_v42, %v2166_v60  ;;  %v965_v46 = vpop.f32.mrb[17].mxu1  ;;  %v1327_v61 = vpop.f32.mrb[17].mxu0 }
 0x129   : > { %v1585_v47 = vmin.f32 %v1553_v40, 6.0  ;;  %v1523_v48 = vadd.f32 %v1491_v39, %v1459_v41  ;;  %v2277_v50 = vadd.f32 %v1327_v61, %v965_v46  ;;  %v1499_v40 = vld [vmem:[%s2616_s12 + $0xb0] sm:$0xff] }
 0x12a   : > { %1618 = vst [vmem:[%s2633_s20 + $0x68] sm:$0xff] %v1586_v43  ;;  %v1556_v51 = vmax.f32 %v1524_v44, 0.0  ;;  %v1462_v52 = vadd.f32 %v2276_v45, %v2621_v63 }
 0x12b   : > { %1617 = vst [vmem:[%s2633_s20 + $0x60] sm:$0xff] %v1585_v47  ;;  %v1555_v62 = vmax.f32 %v1523_v48, 0.0  ;;  %v1461_v0 = vadd.f32 %v2277_v50, %v2621_v63  ;;  %v2169_v1 = vpop.f32.mrb[18].mxu1  ;;  %v2221_v2 = vpop.f32.mrb[18].mxu0  ;;  %v1502_v50 = vld [vmem:[%s2616_s12 + $0xc8] sm:$0xff] }
 0x12c   : > { %v1588_v3 = vmin.f32 %v1556_v51, 6.0  ;;  %v1526_v4 = vadd.f32 %v1494_v49, %v1462_v52  ;;  %v2278_v5 = vadd.f32 %v2221_v2, %v2169_v1  ;;  %v975_v54 = vpop.f32.mrb[19].mxu1  ;;  %v1337_v6 = vpop.f32.mrb[19].mxu0 }
 0x12d   : > { %v1587_v7 = vmin.f32 %v1555_v62, 6.0  ;;  %v1525_v8 = vadd.f32 %v1493_v53, %v1461_v0  ;;  %v2279_v10 = vadd.f32 %v1337_v6, %v975_v54  ;;  %v1501_v62 = vld [vmem:[%s2616_s12 + $0xc0] sm:$0xff] }
 0x12e   : > { %1620 = vst [vmem:[%s2633_s20 + $0x78] sm:$0xff] %v1588_v3  ;;  %v1558_v55 = vmax.f32 %v1526_v4, 0.0  ;;  %v1464_v11 = vadd.f32 %v2278_v5, %v2621_v63 }
 0x12f   : > { %1619 = vst [vmem:[%s2633_s20 + $0x70] sm:$0xff] %v1587_v7  ;;  %v1557_v13 = vmax.f32 %v1525_v8, 0.0  ;;  %v1463_v14 = vadd.f32 %v2279_v10, %v2621_v63  ;;  %v2172_v15 = vpop.f32.mrb[20].mxu1  ;;  %v2224_v16 = vpop.f32.mrb[20].mxu0  ;;  %v1504_v10 = vld [vmem:[%s2616_s12 + $0xd8] sm:$0xff] }
 0x130   : > { %v1590_v17 = vmin.f32 %v1558_v55, 6.0  ;;  %v1528_v56 = vadd.f32 %v1496_v9, %v1464_v11  ;;  %v2280_v18 = vadd.f32 %v2224_v16, %v2172_v15  ;;  %v985_v19 = vpop.f32.mrb[21].mxu1  ;;  %v1347_v20 = vpop.f32.mrb[21].mxu0 }
 0x131   : > { %v1589_v21 = vmin.f32 %v1557_v13, 6.0  ;;  %v1527_v22 = vadd.f32 %v1495_v12, %v1463_v14  ;;  %v2281_v23 = vadd.f32 %v1347_v20, %v985_v19  ;;  %v1503_v13 = vld [vmem:[%s2616_s12 + $0xd0] sm:$0xff] }
 0x132   : > { %1622 = vst [vmem:[%s2633_s20 + $0x88] sm:$0xff] %v1590_v17  ;;  %v1560_v24 = vmax.f32 %v1528_v56, 0.0  ;;  %v1466_v25 = vadd.f32 %v2280_v18, %v2621_v63 }
 0x133   : > { %1621 = vst [vmem:[%s2633_s20 + $0x80] sm:$0xff] %v1589_v21  ;;  %v1559_v27 = vmax.f32 %v1527_v22, 0.0  ;;  %v1465_v28 = vadd.f32 %v2281_v23, %v2621_v63  ;;  %v2175_v29 = vpop.f32.mrb[22].mxu1  ;;  %v2227_v58 = vpop.f32.mrb[22].mxu0  ;;  %v1506_v23 = vld [vmem:[%s2616_s12 + $0xe8] sm:$0xff] }
 0x134   : > { %v1592_v30 = vmin.f32 %v1560_v24, 6.0  ;;  %v1530_v31 = vadd.f32 %v1498_v57, %v1466_v25  ;;  %v2282_v32 = vadd.f32 %v2227_v58, %v2175_v29  ;;  %v995_v33 = vpop.f32.mrb[23].mxu1  ;;  %v1357_v34 = vpop.f32.mrb[23].mxu0 }
 0x135   : > { %v1591_v59 = vmin.f32 %v1559_v27, 6.0  ;;  %v1529_v35 = vadd.f32 %v1497_v26, %v1465_v28  ;;  %v2283_v37 = vadd.f32 %v1357_v34, %v995_v33  ;;  %v1505_v27 = vld [vmem:[%s2616_s12 + $0xe0] sm:$0xff] }
 0x136   : > { %1624 = vst [vmem:[%s2633_s20 + $0x98] sm:$0xff] %v1592_v30  ;;  %v1562_v38 = vmax.f32 %v1530_v31, 0.0  ;;  %v1468_v39 = vadd.f32 %v2282_v32, %v2621_v63 }
 0x137   : > { %1623 = vst [vmem:[%s2633_s20 + $0x90] sm:$0xff] %v1591_v59  ;;  %v1561_v41 = vmax.f32 %v1529_v35, 0.0  ;;  %v1467_v60 = vadd.f32 %v2283_v37, %v2621_v63  ;;  %v2178_v42 = vpop.f32.mrb[24].mxu1  ;;  %v2230_v43 = vpop.f32.mrb[24].mxu0  ;;  %v1508_v37 = vld [vmem:[%s2616_s12 + $0xf8] sm:$0xff] }
 0x138   : > { %v1594_v44 = vmin.f32 %v1562_v38, 6.0  ;;  %v1532_v45 = vadd.f32 %v1500_v36, %v1468_v39  ;;  %v2284_v46 = vadd.f32 %v2230_v43, %v2178_v42  ;;  %v1005_v61 = vpop.f32.mrb[25].mxu1  ;;  %v1367_v47 = vpop.f32.mrb[25].mxu0 }
 0x139   : > { %v1593_v48 = vmin.f32 %v1561_v41, 6.0  ;;  %v1531_v49 = vadd.f32 %v1499_v40, %v1467_v60  ;;  %v2285_v51 = vadd.f32 %v1367_v47, %v1005_v61  ;;  %v1507_v41 = vld [vmem:[%s2616_s12 + $0xf0] sm:$0xff] }
 0x13a   : > { %1626 = vst [vmem:[%s2633_s20 + $0xa8] sm:$0xff] %v1594_v44  ;;  %v1564_v52 = vmax.f32 %v1532_v45, 0.0  ;;  %v1470_v53 = vadd.f32 %v2284_v46, %v2621_v63 }
 0x13b   : > { %1625 = vst [vmem:[%s2633_s20 + $0xa0] sm:$0xff] %v1593_v48  ;;  %v1563_v0 = vmax.f32 %v1531_v49, 0.0  ;;  %v1469_v1 = vadd.f32 %v2285_v51, %v2621_v63  ;;  %v2181_v2 = vpop.f32.mrb[26].mxu1  ;;  %v2233_v3 = vpop.f32.mrb[26].mxu0 }
 0x13c   : > { %v1596_v4 = vmin.f32 %v1564_v52, 6.0  ;;  %v1534_v5 = vadd.f32 %v1502_v50, %v1470_v53  ;;  %v2286_v54 = vadd.f32 %v2233_v3, %v2181_v2  ;;  %v1015_v6 = vpop.f32.mrb[27].mxu1  ;;  %v1377_v7 = vpop.f32.mrb[27].mxu0 }
 0x13d   : > { %v1595_v8 = vmin.f32 %v1563_v0, 6.0  ;;  %v1533_v9 = vadd.f32 %v1501_v62, %v1469_v1  ;;  %v2287_v55 = vadd.f32 %v1377_v7, %v1015_v6 }
 0x13e   : > { %1628 = vst [vmem:[%s2633_s20 + $0xb8] sm:$0xff] %v1596_v4  ;;  %v1566_v11 = vmax.f32 %v1534_v5, 0.0  ;;  %v1472_v12 = vadd.f32 %v2286_v54, %v2621_v63 }
 0x13f   : > { %1627 = vst [vmem:[%s2633_s20 + $0xb0] sm:$0xff] %v1595_v8  ;;  %v1565_v14 = vmax.f32 %v1533_v9, 0.0  ;;  %v1471_v15 = vadd.f32 %v2287_v55, %v2621_v63  ;;  %v2184_v16 = vpop.f32.mrb[28].mxu1  ;;  %v2236_v17 = vpop.f32.mrb[28].mxu0 }
 0x140   : > { %v1598_v56 = vmin.f32 %v1566_v11, 6.0  ;;  %v1536_v18 = vadd.f32 %v1504_v10, %v1472_v12  ;;  %v2288_v19 = vadd.f32 %v2236_v17, %v2184_v16  ;;  %v1025_v20 = vpop.f32.mrb[29].mxu1  ;;  %v1387_v21 = vpop.f32.mrb[29].mxu0 }
 0x141   : > { %v1597_v22 = vmin.f32 %v1565_v14, 6.0  ;;  %v1535_v57 = vadd.f32 %v1503_v13, %v1471_v15  ;;  %v2289_v24 = vadd.f32 %v1387_v21, %v1025_v20 }
 0x142   : > { %1630 = vst [vmem:[%s2633_s20 + $0xc8] sm:$0xff] %v1598_v56  ;;  %v1568_v25 = vmax.f32 %v1536_v18, 0.0  ;;  %v1474_v26 = vadd.f32 %v2288_v19, %v2621_v63 }
 0x143   : > { %1629 = vst [vmem:[%s2633_s20 + $0xc0] sm:$0xff] %v1597_v22  ;;  %v1567_v28 = vmax.f32 %v1535_v57, 0.0  ;;  %v1473_v29 = vadd.f32 %v2289_v24, %v2621_v63  ;;  %v2187_v58 = vpop.f32.mrb[30].mxu1  ;;  %v2239_v30 = vpop.f32.mrb[30].mxu0 }
 0x144   : > { %v1600_v31 = vmin.f32 %v1568_v25, 6.0  ;;  %v1538_v32 = vadd.f32 %v1506_v23, %v1474_v26  ;;  %v2290_v33 = vadd.f32 %v2239_v30, %v2187_v58  ;;  %v1035_v34 = vpop.f32.mrb[31].mxu1  ;;  %v1397_v59 = vpop.f32.mrb[31].mxu0 }
 0x145   : > { %v1599_v35 = vmin.f32 %v1567_v28, 6.0  ;;  %v1537_v36 = vadd.f32 %v1505_v27, %v1473_v29  ;;  %v2291_v38 = vadd.f32 %v1397_v59, %v1035_v34 }
 0x146   : > { %1632 = vst [vmem:[%s2633_s20 + $0xd8] sm:$0xff] %v1600_v31  ;;  %v1570_v39 = vmax.f32 %v1538_v32, 0.0  ;;  %v1476_v40 = vadd.f32 %v2290_v33, %v2621_v63 }
 0x147   : > { %1631 = vst [vmem:[%s2633_s20 + $0xd0] sm:$0xff] %v1599_v35  ;;  %v1569_v60 = vmax.f32 %v1537_v36, 0.0  ;;  %v1475_v42 = vadd.f32 %v2291_v38, %v2621_v63 }
 0x148   : > { %v1602_v43 = vmin.f32 %v1570_v39, 6.0  ;;  %v1540_v44 = vadd.f32 %v1508_v37, %v1476_v40 }
 0x149   : > { %v1601_v45 = vmin.f32 %v1569_v60, 6.0  ;;  %v1539_v46 = vadd.f32 %v1507_v41, %v1475_v42 }
 0x14a   : > { %1634 = vst [vmem:[%s2633_s20 + $0xe8] sm:$0xff] %v1602_v43  ;;  %v1572_v61 = vmax.f32 %v1540_v44, 0.0 }
 0x14b   : > { %1633 = vst [vmem:[%s2633_s20 + $0xe0] sm:$0xff] %v1601_v45  ;;  %v1571_v47 = vmax.f32 %v1539_v46, 0.0 }
 0x14c   : > { %v1604_v48 = vmin.f32 %v1572_v61, 6.0 }
 0x14d   : > { %v1603_v49 = vmin.f32 %v1571_v47, 6.0 }
 0x14e   : > { %1636 = vst [vmem:[%s2633_s20 + $0xf8] sm:$0xff] %v1604_v48 }
 0x14f   : > { %1635 = vst [vmem:[%s2633_s20 + $0xf0] sm:$0xff] %v1603_v49 }
 0x150 PF: > { %s14_s17 = sadd.s32 1, %s2372_s17   ;;  %s2748_s15 = smov %s2368_s16 }
 0x151   : > { %p11_p5 = scmp.ge.s32.totalorder %s14_s17, 4   ;;  %s2749_s16 = smov %s2751_s18 }
 0x153   :  { %13 = sbr.rel (!%p11_p5) target bundleno = 2 (0x2), region = 80 }

</bundles_post_ra>
